<compile_context>
chip_gen: v7x
topology: tpu7x:2x2x1
jax: 0.10.0
libtpu: 0.0.40
codegen_flags: <defaults>
</compile_context>

<pallas_src>
import functools
import math

import jax
import jax.numpy as jnp
from jax.experimental import pallas as pl
from jax.experimental.pallas import tpu as pltpu

LANE = 128
SUBLANE = 8


def _round_up(x, m):
    return (x + m - 1) // m * m


def _sublane_rows(dtype):
    # rows of the second-minor dim packed per (8,128) f32-equivalent tile
    return 16 if jnp.dtype(dtype) == jnp.dtype(jnp.bfloat16) else 8


def _largest_divisor_tile(m_pad, g, max_tile):
    """Largest multiple of g that divides m_pad and is <= max_tile."""
    q = m_pad // g
    cap = max(1, max_tile // g)
    if q <= cap:
        return m_pad
    best = 1
    i = 1
    while i * i <= q:
        if q % i == 0:
            for d in (i, q // i):
                if d <= cap and d > best:
                    best = d
        i += 1
    return best * g


def _combined_loss_kernel(p_ref, t_ref, acc_ref, *, alpha, gamma, tile_m):
    """Grid: (B, n_split, m_steps); m (reduction) is the last axis.

    acc_ref is a (1, 1, 32, 128) f32 block revisited across m:
      rows  0: 7  -> focal partial sums
      rows  8:15 -> sum(p * t) partials
      rows 16:23 -> sum(p * p) partials
      rows 24:31 -> sum(t * t) partials
    """
    m = pl.program_id(2)

    @pl.when(m == 0)
    def _():
        acc_ref[...] = jnp.zeros_like(acc_ref)

    p = p_ref[0].astype(jnp.float32)      # (tile_m, 128)
    t = t_ref[0].astype(jnp.float32)      # binary masks are exact in bf16/f32

    # --- focal loss term (pure elementwise, VPU/EUP) ---
    # Exact `t == 1.0` compare matches the PyTorch reference; soft labels fall
    # into the "background" branch there too.
    is_fg = t == 1.0
    pt = jnp.where(is_fg, p, 1.0 - p)
    # Clamp so saturated predictions (pt == 0) stay finite (ref gives inf/nan).
    pt = jnp.maximum(pt, jnp.float32(1e-12))
    # Fold the leading minus sign into alpha_t (one fewer VALU op per element).
    neg_alpha_t = jnp.where(is_fg, jnp.float32(-alpha), jnp.float32(alpha - 1.0))
    one_minus_pt = 1.0 - pt
    if float(gamma) == 2.0:
        focal_w = one_minus_pt * one_minus_pt      # skip the EUP pow path
    else:
        focal_w = one_minus_pt ** jnp.float32(gamma)
    focal = neg_alpha_t * focal_w * jnp.log(pt)

    # Sublane-group partial sums: (tile_m, 128) -> (8, 128).
    # Pure VPU vreg adds; no XLU cross-lane reduce, no SMEM scalar chain.
    def red(x):
        return x.reshape(tile_m // SUBLANE, SUBLANE, LANE).sum(axis=0)

    upd = jnp.concatenate(
        [red(focal), red(p * t), red(p * p), red(t * t)], axis=0)
    acc_ref[...] = acc_ref[...] + upd.reshape(1, 1, 4 * SUBLANE, LANE)


def combined_loss(preds, targets, w1=1.0, w2=1.0, alpha=0.25, gamma=2.0,
                  epsilon=1e-6, max_tile_m=4096):
    B = preds.shape[0]
    n_per = math.prod(preds.shape[1:])

    # Stream inputs in their own dtype when f32/bf16 (no standalone cast pass);
    # anything else (e.g. bool/int masks) is cast to f32 once in the wrapper.
    # TODO(synk): stream uint8/bool masks directly (1 B/elem) once needed.
    p_in = preds if preds.dtype in (jnp.float32, jnp.bfloat16) \
        else preds.astype(jnp.float32)
    t_in = targets if targets.dtype in (jnp.float32, jnp.bfloat16) \
        else targets.astype(jnp.float32)

    grain = max(_sublane_rows(p_in.dtype), _sublane_rows(t_in.dtype))
    max_tile_eff = max(grain, (int(max_tile_m) // grain) * grain)

    p_flat = p_in.reshape(B, n_per)
    t_flat = t_in.reshape(B, n_per)

    M = pl.cdiv(n_per, LANE)
    m_pad = _round_up(M, grain)

    # Prefer a tile that divides m_pad exactly: when n_per is already a
    # multiple of grain*128 (common for conv feature maps) no jnp.pad copy of
    # the f32 preds is ever made.
    tile_m = _largest_divisor_tile(m_pad, grain, max_tile_eff)
    if tile_m < min(1024, m_pad):
        # Degenerate divisor structure (e.g. prime row count): accept a rare
        # pad copy so the kernel keeps large tiles / few grid steps.
        tile_m = min(max_tile_eff, m_pad)
        m_pad = _round_up(m_pad, tile_m)

    pad = m_pad * LANE - n_per
    if pad:
        # Zero padding contributes exactly 0 to focal and every dice partial.
        p_flat = jnp.pad(p_flat, ((0, 0), (0, pad)))
        t_flat = jnp.pad(t_flat, ((0, 0), (0, pad)))
    p3 = p_flat.reshape(B, m_pad, LANE)
    t3 = t_flat.reshape(B, m_pad, LANE)

    n_m_steps = m_pad // tile_m
    # Parallel split of the m axis so both v7x TensorCores are used even for
    # B == 1 / odd B (no-op on single-TC v5e/v6e).
    n_split = 2 if (n_m_steps >= 2 and n_m_steps % 2 == 0) else 1
    steps = n_m_steps // n_split

    kernel = functools.partial(_combined_loss_kernel, alpha=float(alpha),
                               gamma=float(gamma), tile_m=tile_m)

    acc_shape = jax.ShapeDtypeStruct((B, n_split, 4 * SUBLANE, LANE),
                                     jnp.float32)
    p_item = jnp.dtype(p3.dtype).itemsize
    t_item = jnp.dtype(t3.dtype).itemsize

    cost = pl.CostEstimate(
        flops=int(16 * B * n_per),
        transcendentals=int(B * n_per),
        bytes_accessed=int(B * m_pad * LANE * (p_item + t_item)
                           + B * n_split * 4 * SUBLANE * LANE * 4),
    )

    acc = pl.pallas_call(
        kernel,
        out_shape=acc_shape,
        grid_spec=pltpu.PrefetchScalarGridSpec(
            num_scalar_prefetch=0,
            grid=(B, n_split, steps),
            in_specs=[
                pl.BlockSpec((1, tile_m, LANE),
                             lambda b, s, m: (b, s * steps + m, 0)),
                pl.BlockSpec((1, tile_m, LANE),
                             lambda b, s, m: (b, s * steps + m, 0)),
            ],
            out_specs=pl.BlockSpec((1, 1, 4 * SUBLANE, LANE),
                                   lambda b, s, m: (b, s, 0, 0)),
        ),
        compiler_params=pltpu.CompilerParams(
            dimension_semantics=("parallel", "parallel", "arbitrary"),
            # Explicit so large tiles also compile on v5e's 16 MiB default
            # scoped VMEM; well under v7x's 64 MiB physical VMEM.
            vmem_limit_bytes=48 * 1024 * 1024,
        ),
        cost_estimate=cost,
    )(p3, t3)

    # Tiny final reductions + w1/w2 combine stay in XLA (negligible cost).
    focal_sum = jnp.sum(acc[:, :, 0:SUBLANE, :])
    pt_sum = jnp.sum(acc[:, :, SUBLANE:2 * SUBLANE, :], axis=(1, 2, 3))
    pp_sum = jnp.sum(acc[:, :, 2 * SUBLANE:3 * SUBLANE, :], axis=(1, 2, 3))
    tt_sum = jnp.sum(acc[:, :, 3 * SUBLANE:4 * SUBLANE, :], axis=(1, 2, 3))

    focal_mean = focal_sum / jnp.float32(B * n_per)
    num = 2.0 * pt_sum + epsilon
    den = pp_sum + tt_sum + epsilon
    dice_mean = jnp.mean(1.0 - num / den)
    return w1 * focal_mean + w2 * dice_mean


def _reference_combined_loss(preds, targets, w1=1.0, w2=1.0, alpha=0.25,
                             gamma=2.0, epsilon=1e-6):
    p = preds.astype(jnp.float32)
    t = targets.astype(jnp.float32)
    pt = jnp.where(t == 1.0, p, 1.0 - p)
    alpha_t = jnp.where(t == 1.0, alpha, 1.0 - alpha)
    focal = jnp.mean(-alpha_t * (1.0 - pt) ** gamma * jnp.log(pt))
    num = 2.0 * jnp.sum(p * t, axis=(1, 2, 3)) + epsilon
    den = (jnp.sum(p * p, axis=(1, 2, 3))
           + jnp.sum(t * t, axis=(1, 2, 3)) + epsilon)
    dice = jnp.mean(1.0 - num / den)
    return w1 * focal + w2 * dice


if __name__ == "__main__":
    key = jax.random.PRNGKey(0)
    kp, kt = jax.random.split(key)

    B, C, H, W = 2, 4, 16, 16
    # preds: probabilities strictly inside (0, 1) so log(pt) is finite.
    preds = jax.random.uniform(kp, (B, C, H, W), dtype=jnp.float32,
                               minval=0.05, maxval=0.95)
    # targets: binary mask in {0., 1.}
    targets = jax.random.bernoulli(kt, p=0.5, shape=(B, C, H, W)).astype(
        jnp.float32)

    loss = combined_loss(preds, targets)
    loss = jax.block_until_ready(loss)

    ref = _reference_combined_loss(preds, targets)
    assert jnp.isfinite(loss), "kernel produced non-finite loss"
    assert jnp.allclose(loss, ref, rtol=1e-5, atol=1e-5), (loss, ref)

    print("KERNEL_OK")
</pallas_src>

<mosaic_0001>
module attributes {stable_mosaic.version = 11 : i64} {
  func.func @_combined_loss_kernel(%arg0: i32, %arg1: i32, %arg2: i32, %arg3: memref<1x8x128xf32, #tpu.memory_space<vmem>>, %arg4: memref<1x8x128xf32, #tpu.memory_space<vmem>>, %arg5: memref<1x1x32x128xf32, #tpu.memory_space<vmem>>) attributes {dimension_semantics = [#tpu.dimension_semantics<parallel>, #tpu.dimension_semantics<parallel>, #tpu.dimension_semantics<arbitrary>], iteration_bounds = array<i64: 2, 1, 1>, scalar_prefetch = 0 : i64, scratch_operands = 0 : i64, tpu.core_type = #tpu.core_type<tc>, window_params = [{transform_indices = @transform_0, window_bounds = array<i64: 1, 8, 128>}, {transform_indices = @transform_1, window_bounds = array<i64: 1, 8, 128>}, {transform_indices = @transform_2, window_bounds = array<i64: 1, 1, 32, 128>}]} {
    %c0_i32 = arith.constant 0 : i32
    %0 = arith.cmpi eq, %arg2, %c0_i32 : i32
    %1 = arith.extui %0 : i1 to i32
    %c0_i32_0 = arith.constant 0 : i32
    %2 = arith.cmpi ne, %1, %c0_i32_0 : i32
    scf.if %2 {
      %cst_23 = arith.constant 0.000000e+00 : f32
      %39 = vector.broadcast %cst_23 : f32 to vector<1x1x32x128xf32>
      %c0_24 = arith.constant 0 : index
      %c0_25 = arith.constant 0 : index
      %c0_26 = arith.constant 0 : index
      %c0_27 = arith.constant 0 : index
      %40 = vector.load %arg5[%c0_24, %c0_25, %c0_26, %c0_27] : memref<1x1x32x128xf32, #tpu.memory_space<vmem>>, vector<1x1x32x128xf32>
      tpu.vector_store %arg5[%c0_24, %c0_25, %c0_26, %c0_27], %39 {strides = array<i32>} : memref<1x1x32x128xf32, #tpu.memory_space<vmem>>, vector<1x1x32x128xf32>,
    } else {
    }
    %c0 = arith.constant 0 : index
    %c0_1 = arith.constant 0 : index
    %c0_2 = arith.constant 0 : index
    %3 = vector.load %arg3[%c0, %c0_1, %c0_2] : memref<1x8x128xf32, #tpu.memory_space<vmem>>, vector<1x8x128xf32>
    %4 = vector.shape_cast %3 : vector<1x8x128xf32> to vector<8x128xf32>
    %c0_3 = arith.constant 0 : index
    %c0_4 = arith.constant 0 : index
    %c0_5 = arith.constant 0 : index
    %5 = vector.load %arg4[%c0_3, %c0_4, %c0_5] : memref<1x8x128xf32, #tpu.memory_space<vmem>>, vector<1x8x128xf32>
    %6 = vector.shape_cast %5 : vector<1x8x128xf32> to vector<8x128xf32>
    %cst = arith.constant 1.000000e+00 : f32
    %7 = vector.broadcast %cst : f32 to vector<8x128xf32>
    %8 = arith.cmpf oeq, %6, %7 : vector<8x128xf32>
    %cst_6 = arith.constant 1.000000e+00 : f32
    %9 = vector.broadcast %cst_6 : f32 to vector<8x128xf32>
    %10 = arith.subf %9, %4 : vector<8x128xf32>
    %11 = arith.select %8, %4, %10 : vector<8x128xi1>, vector<8x128xf32>
    %cst_7 = arith.constant 9.99999996E-13 : f32
    %12 = vector.broadcast %cst_7 : f32 to vector<8x128xf32>
    %13 = arith.maximumf %11, %12 : vector<8x128xf32>
    %cst_8 = arith.constant -2.500000e-01 : f32
    %cst_9 = arith.constant -7.500000e-01 : f32
    %14 = vector.broadcast %cst_8 : f32 to vector<8x128xf32>
    %15 = vector.broadcast %cst_9 : f32 to vector<8x128xf32>
    %16 = arith.select %8, %14, %15 : vector<8x128xi1>, vector<8x128xf32>
    %cst_10 = arith.constant 1.000000e+00 : f32
    %17 = vector.broadcast %cst_10 : f32 to vector<8x128xf32>
    %18 = arith.subf %17, %13 : vector<8x128xf32>
    %19 = arith.mulf %18, %18 : vector<8x128xf32>
    %20 = arith.mulf %16, %19 : vector<8x128xf32>
    %21 = math.log %13 : vector<8x128xf32>
    %22 = arith.mulf %20, %21 : vector<8x128xf32>
    %23 = vector.shape_cast %22 : vector<8x128xf32> to vector<1x8x128xf32>
    %cst_11 = arith.constant dense<0.000000e+00> : vector<8x128xf32>
    %24 = vector.multi_reduction <add>, %23, %cst_11 [0] : vector<1x8x128xf32> to vector<8x128xf32>
    %25 = arith.mulf %4, %6 : vector<8x128xf32>
    %26 = vector.shape_cast %25 : vector<8x128xf32> to vector<1x8x128xf32>
    %cst_12 = arith.constant dense<0.000000e+00> : vector<8x128xf32>
    %27 = vector.multi_reduction <add>, %26, %cst_12 [0] : vector<1x8x128xf32> to vector<8x128xf32>
    %28 = arith.mulf %4, %4 : vector<8x128xf32>
    %29 = vector.shape_cast %28 : vector<8x128xf32> to vector<1x8x128xf32>
    %cst_13 = arith.constant dense<0.000000e+00> : vector<8x128xf32>
    %30 = vector.multi_reduction <add>, %29, %cst_13 [0] : vector<1x8x128xf32> to vector<8x128xf32>
    %31 = arith.mulf %6, %6 : vector<8x128xf32>
    %32 = vector.shape_cast %31 : vector<8x128xf32> to vector<1x8x128xf32>
    %cst_14 = arith.constant dense<0.000000e+00> : vector<8x128xf32>
    %33 = vector.multi_reduction <add>, %32, %cst_14 [0] : vector<1x8x128xf32> to vector<8x128xf32>
    %34 = tpu.concatenate %24, %27, %30, %33 in 0 : vector<8x128xf32>, vector<8x128xf32>, vector<8x128xf32>, vector<8x128xf32> -> vector<32x128xf32>
    %c0_15 = arith.constant 0 : index
    %c0_16 = arith.constant 0 : index
    %c0_17 = arith.constant 0 : index
    %c0_18 = arith.constant 0 : index
    %35 = vector.load %arg5[%c0_15, %c0_16, %c0_17, %c0_18] : memref<1x1x32x128xf32, #tpu.memory_space<vmem>>, vector<1x1x32x128xf32>
    %36 = vector.shape_cast %34 : vector<32x128xf32> to vector<1x1x32x128xf32>
    %37 = arith.addf %35, %36 : vector<1x1x32x128xf32>
    %c0_19 = arith.constant 0 : index
    %c0_20 = arith.constant 0 : index
    %c0_21 = arith.constant 0 : index
    %c0_22 = arith.constant 0 : index
    %38 = vector.load %arg5[%c0_19, %c0_20, %c0_21, %c0_22] : memref<1x1x32x128xf32, #tpu.memory_space<vmem>>, vector<1x1x32x128xf32>
    tpu.vector_store %arg5[%c0_19, %c0_20, %c0_21, %c0_22], %37 {strides = array<i32>} : memref<1x1x32x128xf32, #tpu.memory_space<vmem>>, vector<1x1x32x128xf32>,
    return
  }
  func.func @transform_0(%arg0: i32, %arg1: i32, %arg2: i32) -> (i32, i32, i32) {
    %c1_i32 = arith.constant 1 : i32
    %0 = arith.muli %arg1, %c1_i32 : i32
    %1 = arith.addi %0, %arg2 : i32
    %c0_i32 = arith.constant 0 : i32
    %c0_i32_0 = arith.constant 0 : i32
    return %arg0, %1, %c0_i32 : i32, i32, i32
  }
  func.func @transform_1(%arg0: i32, %arg1: i32, %arg2: i32) -> (i32, i32, i32) {
    %c1_i32 = arith.constant 1 : i32
    %0 = arith.muli %arg1, %c1_i32 : i32
    %1 = arith.addi %0, %arg2 : i32
    %c0_i32 = arith.constant 0 : i32
    %c0_i32_0 = arith.constant 0 : i32
    return %arg0, %1, %c0_i32 : i32, i32, i32
  }
  func.func @transform_2(%arg0: i32, %arg1: i32, %arg2: i32) -> (i32, i32, i32, i32) {
    %c0_i32 = arith.constant 0 : i32
    %c0_i32_0 = arith.constant 0 : i32
    %c0_i32_1 = arith.constant 0 : i32
    return %arg0, %arg1, %c0_i32, %c0_i32_0 : i32, i32, i32, i32
  }
}

</mosaic_0001>

<bundles_post_ra>
// kernel: tpu_custom_call.1
= control target key start
LH: loop header
LB: loop body
LE: loop exit
PB: predicated region body
PF: predicated region fallthrough
CT: control target
= control target key end

     0   :  { %7 = vsyncpa [#allocation3], 0  ;;  %s884_s0 = inlined_call_operand.hbm [shape: f32[2,8,128], index: 0, kind: input, shape index: {}]   ;;  %s885_s1 = inlined_call_operand.hbm [shape: f32[2,8,128], index: 1, kind: input, shape index: {}]   ;;  %s886_s2 = inlined_call_operand.hbm [shape: f32[2,1,32,128], index: 2, kind: output, shape index: {}]  }
   0x1   :  { %9 = vsyncpa [#allocation3 + $0x1], 0 }
   0x2   :  { %10 = vsyncpa [#allocation6], 0 }
   0x3   :  { %12 = vsyncpa [#allocation6 + $0x1], 0 }
   0x4   :  { %13 = vsyncpa [#allocation4], 0 }
   0x5   :  { %15 = vsyncpa [#allocation4 + $0x1], 0  ;;  %s661_s9 = smov 0   ;;  %s663_s10 = smov 0  }
   0x6   :  { %s665_s11 = smov 0   ;;  %s667_s12 = smov 0  }
   0x7   :  { %s669_s13 = smov 0   ;;  %s671_s14 = smov 0  }
   0x8 LB: > { %s401_s15 = sadd.s32 4294967295, %s638_s14   ;;  %s402_s16 = sadd.s32 4294967294, %s638_s14   ;;  %s638_s14 = sphi %s671_s14, %s21_s14   ;;  %s634_s13 = sphi %s669_s13, %s906_s13   ;;  %s630_s12 = sphi %s667_s12, %s905_s12   ;;  %s626_s11 = sphi %s665_s11, %s904_s11   ;;  %s622_s10 = sphi %s663_s10, %s903_s10   ;;  %s618_s9 = sphi %s661_s9, %s902_s9  }
   0x9   : > { %s40_s17 = sadd.s32 1, %s634_s13  ;;  %s51_s18 = sadd.s32 1, %s626_s11 }
   0xa   : > { %p42_p0 = scmp.ge.s32.totalorder %s40_s17, 2  ;;  %p58_p1 = scmp.ne.s32.totalorder %s626_s11, %s622_s10 }
   0xb   : > { %p59_p2 = scmp.eq.s32.totalorder %s638_s14, 0  ;;  %p64_p3 = scmp.ne.s32.totalorder %s622_s10, %s618_s9 }
   0xc   : > { %s908_s17 = smov (%p42_p0, %s40_s17), 0  ;;  %p65_p5 = scmp.eq.s32.totalorder %s401_s15, 0 }
   0xd   : > { %p702_p4 = por %p59_p2, %p58_p1  ;;  %s46_s20 = ssub.s32 %s634_s13, %s908_s17 }
   0xe   : > { %p120_p6 = scmp.eq.s32.totalorder %s401_s15, 1  ;;  %p49_p7 = scmp.eq.s32.totalorder %s46_s20, 0 }
   0xf   : > { %p708_p8 = por %p65_p5, %p64_p3  ;;  %p126_p10 = scmp.eq.s32.totalorder %s402_s16, 1 }
  0x10   : > { %p712_p9 = por %p120_p6, %p58_p1  ;;  %p436_p13 = scmp.lt.s32.totalorder %s638_s14, 2 }
  0x11   : > { %s890_s21 = scalar_select %p708_p8, 1, 0 }
  0x12   : > { %s891_s22 = scalar_select %p712_p9, 1, 0 }
  0x13   : > { %s717_s23 = scalar_select %p49_p7, %s626_s11, %s51_s18  }
  0x14   : > { %p719_p11 = por %p126_p10, %p64_p3  ;;  %s726_s25 = sand.u32 1, %s626_s11  }
  0x15   : > { %s405_s26 = sshll.u32 %s726_s25, 3  ;;  %s406_s27 = sshll.u32 %s634_s13, 7 }
  0x16   : > { %s892_s24 = scalar_select %p719_p11, 1, 0 }
  0x17   : > { %s735_s30 = scalar_lea.hbm %s884_s0, %s406_s27  ;;  %s150_s3 = scalar_lea.vmem [#allocation2], %s405_s26 }
  0x18   : > { %s159_s4 = sshll.u32 %s150_s3, 4  ;;  %p743_p0 = pnand %p436_p13, %p702_p4  ;;  %s739_s4 = int_to_ptr.vmem [resolvable:$true] %s159_s4 }
  0x19   : > { %s147_s6 = scalar_lea.sflag [#allocation3], %s726_s25  ;;  %s492_s7 = scalar_lea.hbm %s735_s30, 128 }
  0x1a   : > { %p493_p3 = scmp.ne.s32.totalorder %s735_s30, %s492_s7  ;;  %p494_p5 = pneg %p743_p0 }
  0x1b   : > { %s497_s16 = scalar_lea.hbm %s884_s0, 256  ;;  %p498_p4 = scmp.lt.u32.totalorder %s735_s30, %s884_s0 }
  0x1c   : > { %p495_p6 = pnand %p494_p5, %p493_p3  ;;  %p499_p10 = scmp.lt.u32.totalorder %s497_s16, %s492_s7 }
  0x1d   : > { %p501_p12 = scmp.lt.u32.totalorder %s492_s7, %s735_s30 }
  0x1e   : > { %p496_p7 = pneg %p495_p6  ;;  %p500_p13 = por %p499_p10, %p498_p4 }
  0x20   : > { %p502_p1 = por %p501_p12, %p500_p13 }
  0x22   : > { %p503_p2 = pnand %p502_p1, %p496_p7 }
  0x24   : > { %506 = shalt.err (!%p503_p2)
}
  0x25   : > { %s507_s20 = scalar_lea.vmem %s739_s4, 128  ;;  %s640_s28 = smov [#allocation2]  }
  0x26   : > { %p508_p3 = scmp.ne.s32.totalorder %s739_s4, %s507_s20  ;;  %s512_s29 = sshll.u32 %s640_s28, 4  ;;  %s513_s29 = int_to_ptr.vmem [resolvable:$false] %s512_s29 }
  0x27   : > { %s514_s3 = scalar_lea.vmem %s513_s29, 256  ;;  %p515_p9 = scmp.lt.s32.totalorder %s739_s4, %s513_s29 }
  0x28   : > { %p510_p6 = pnand %p508_p3, %p494_p5  ;;  %p516_p4 = scmp.lt.s32.totalorder %s514_s3, %s507_s20 }
  0x2a   : > { %p511_p11 = pneg %p510_p6  ;;  %p517_p10 = por %p516_p4, %p515_p9 }
  0x2c   : > { %p518_p12 = pnand %p517_p10, %p511_p11 }
  0x2e   : > { %521 = shalt.err (!%p518_p12)
}
  0x2f   : > { %428 = dma.hbm_to_vmem [thread:$0]  (!%p743_p0), %s735_s30, 128, %s739_s4, %s147_s6  }
  0x30   : > { %p894_p1 = scmp.lt.s32.totalorder %s638_s14, 3  ;;  %p895_p2 = scmp.ge.s32.totalorder %s638_s14, 1 }
  0x31   : > { %s788_s16 = scalar_lea.hbm %s885_s1, %s406_s27  ;;  %s170_s18 = scalar_lea.vmem [#allocation5], %s405_s26 }
  0x32   : > { %p779_p7 = pnand %p895_p2, %p894_p1  ;;  %s179_s19 = sshll.u32 %s170_s18, 4  ;;  %s180_s19 = int_to_ptr.vmem [resolvable:$true] %s179_s19 }
  0x33   : > { %s167_s30 = scalar_lea.sflag [#allocation6], %s726_s25  ;;  %s522_s4 = scalar_lea.hbm %s788_s16, 128 }
  0x34   : > { %s896_s7 = scalar_select %p779_p7, 1, 0 }
  0x35   : > { %p523_p9 = scmp.ne.s32.totalorder %s788_s16, %s522_s4  ;;  %s527_s27 = scalar_lea.hbm %s885_s1, 256 }
  0x36   : > { %p528_p3 = scmp.lt.u32.totalorder %s788_s16, %s885_s1  ;;  %p529_p6 = scmp.lt.u32.totalorder %s527_s27, %s522_s4 }
  0x37   : > { %p525_p11 = pnand %p523_p9, %p494_p5  ;;  %p531_p10 = scmp.lt.u32.totalorder %s522_s4, %s788_s16 }
  0x38   : > { %p530_p4 = por %p529_p6, %p528_p3 }
  0x39   : > { %p526_p13 = pneg %p525_p11 }
  0x3a   : > { %p532_p12 = por %p531_p10, %p530_p4 }
  0x3c   : > { %p533_p1 = pnand %p532_p12, %p526_p13 }
  0x3e   : > { %536 = shalt.err (!%p533_p1)
}
  0x3f   : > { %s537_s25 = scalar_lea.vmem %s180_s19, 128  ;;  %s641_s26 = smov [#allocation5]  }
  0x40   : > { %p538_p2 = scmp.ne.s32.totalorder %s180_s19, %s537_s25  ;;  %s542_s3 = sshll.u32 %s641_s26, 4  ;;  %s543_s3 = int_to_ptr.vmem [resolvable:$false] %s542_s3 }
  0x41   : > { %s544_s8 = scalar_lea.vmem %s543_s3, 256  ;;  %p545_p8 = scmp.lt.s32.totalorder %s180_s19, %s543_s3 }
  0x42   : > { %p540_p9 = pnand %p538_p2, %p494_p5  ;;  %p546_p7 = scmp.lt.s32.totalorder %s544_s8, %s537_s25 }
  0x44   : > { %p541_p11 = pneg %p540_p9  ;;  %p547_p3 = por %p546_p7, %p545_p8 }
  0x46   : > { %p548_p6 = pnand %p547_p3, %p541_p11 }
  0x48   : > { %551 = shalt.err (!%p548_p6)
}
  0x49   : > { %431 = dma.hbm_to_vmem [thread:$0]  (!%p743_p0), %s788_s16, 128, %s180_s19, %s167_s30  }
  0x4a   : > { %p897_p13 = scmp.ne.s32.totalorder %s896_s7, 0 }
  0x4b   : > { %s815_s15 = sand.u32 (!%p897_p13), 1, %s622_s10   ;;  %p898_p5 = scmp.ne.s32.totalorder (!%p897_p13), %s890_s21, 0 }
  0x4c   : > { %188 = sbr.rel (%p897_p13) target bundleno = 122 (0x7a), region = 28  ;;  %s410_s18 = sshll.u32 (!%p897_p13), %s815_s15, 3 }
  0x4d   : > { %s191_s4 = scalar_lea.sflag (!%p897_p13), [#allocation3], %s815_s15  ;;  %s194_s6 = scalar_lea.vmem (!%p897_p13), [#allocation2], %s410_s18 }
  0x53   : > { %605 = dma.done.wait (%p898_p5), %s191_s4, 128  }
  0x54   : > { %607 = vsyncadd (%p898_p5), %s191_s4, 4294967168  ;;  %s200_s5 = scalar_lea.sflag [#allocation6], %s815_s15  ;;  %s203_s16 = scalar_lea.vmem [#allocation5], %s410_s18 }
  0x55   : > { %609 = dma.done.wait (%p898_p5), %s200_s5, 128  }
  0x56   : > { %611 = vsyncadd (%p898_p5), %s200_s5, 4294967168  ;;  %s412_s7 = sshll.u32 %s815_s15, 5  ;;  %v239_v0 = vld [vmem:[%s194_s6] sm:$0xff]  ;;  %v240_v1 = vld [vmem:[%s203_s16] sm:$0xff]  ;;  %v642_v10 = vmov -0.75   ;;  %s418_s21 = sshll.u32 %s630_s12, 9 }
  0x57   : > { %vm241_vm0 = vcmp.eq.f32.partialorder %v240_v1, 1.0  ;;  %v242_v2 = vsub.f32 1.0, %v239_v0  ;;  %v253_v3 = vmul.f32 %v240_v1, %v239_v0  ;;  %v255_v4 = vmul.f32 %v239_v0, %v239_v0  ;;  %s228_s19 = scalar_lea.vmem [#allocation7], %s412_s7  ;;  %s833_s28 = scalar_lea.hbm %s886_s2, %s418_s21 }
  0x58   : > { %v257_v5 = vmul.f32 %v240_v1, %v240_v1  ;;  %v245_v11 = vsel %vm241_vm0, -0.25, %v642_v10  ;;  %s287_s30 = sshll.u32 %s228_s19, 4  ;;  %s272_s29 = scalar_lea.sflag [#allocation4], %s815_s15  ;;  %s835_s30 = int_to_ptr.vmem [resolvable:$true] %s287_s30 }
  0x59   : > { %v243_v6 = vsel %vm241_vm0, %v239_v0, %v242_v2  ;;  %268 = vst [vmem:[%s228_s19 + $0x8] sm:$0xff] %v253_v3  ;;  %269 = vst [vmem:[%s228_s19 + $0x10] sm:$0xff] %v255_v4  ;;  %s552_s25 = scalar_lea.vmem %s835_s30, 512  ;;  %p899_p0 = scmp.ne.s32.totalorder %s891_s22, 0 }
  0x5a   : > { %v244_v7 = vmax.f32 %v243_v6, 1e-12  ;;  %270 = vst [vmem:[%s228_s19 + $0x18] sm:$0xff] %v257_v5  ;;  %p553_p8 = scmp.ne.s32.totalorder %s835_s30, %s552_s25  ;;  %s643_s12 = smov [#allocation7]  }
  0x5b   : > { %s556_s26 = sshll.u32 %s643_s12, 4  ;;  %s557_s26 = int_to_ptr.vmem [resolvable:$false] %s556_s26 }
  0x5c   : > { %490 = vlog2.f32 %v244_v7  ;;  %v246_v8 = vsub.f32 1.0, %v244_v7  ;;  %p554_p7 = pnand %p553_p8, %p899_p0  ;;  %s558_s3 = scalar_lea.vmem %s557_s26, 1024 }
  0x5d   : > { %p559_p10 = scmp.lt.s32.totalorder %s835_s30, %s557_s26  ;;  %p560_p12 = scmp.lt.s32.totalorder %s558_s3, %s552_s25 }
  0x5e   : > { %v247_v9 = vmul.f32 %v246_v8, %v246_v8  ;;  %p555_p4 = pneg %p554_p7 }
  0x5f   : > { %p561_p1 = por %p560_p12, %p559_p10 }
  0x60   : > { %v248_v12 = vmul.f32 %v247_v9, %v245_v11 }
  0x61   : > { %p562_p2 = pnand %p561_p1, %p555_p4 }
  0x66   : > { %v491_v13 = vpop.eup %490 }
  0x67   : > { %v250_v14 = vmul.f32 0.6931472, %v491_v13 }
  0x69   : > { %v251_v15 = vmul.f32 %v250_v14, %v248_v12 }
  0x6b   : > { %267 = vst [vmem:[%s228_s19] sm:$0xff] %v251_v15 }
  0x6c   : > { %565 = shalt.err (!%p562_p2)
}
  0x6d   : > { %s566_s8 = scalar_lea.hbm %s833_s28, 512  ;;  %s570_s6 = scalar_lea.hbm %s886_s2, 1024 }
  0x6e   : > { %p567_p9 = scmp.ne.s32.totalorder %s833_s28, %s566_s8  ;;  %p571_p6 = scmp.lt.u32.totalorder %s833_s28, %s886_s2 }
  0x6f   : > { %p572_p13 = scmp.lt.u32.totalorder %s570_s6, %s566_s8  ;;  %p574_p8 = scmp.lt.u32.totalorder %s566_s8, %s833_s28 }
  0x70   : > { %p568_p11 = pnand %p567_p9, %p899_p0 }
  0x71   : > { %p573_p5 = por %p572_p13, %p571_p6 }
  0x72   : > { %p569_p3 = pneg %p568_p11 }
  0x73   : > { %p575_p7 = por %p574_p8, %p573_p5 }
  0x75   : > { %p576_p4 = pnand %p575_p7, %p569_p3 }
  0x77   : > { %579 = shalt.err (!%p576_p4)
}
  0x78   : > { %s644_s7 = smov 128   ;;  %s645_s19 = smov 8  }
  0x79   : > { %423 = dma.vmem_to_hbm [thread:$0]  (%p899_p0), %s835_s30, 512, %s833_s28, %s272_s29, %s644_s7, %s644_s7, %s645_s19  }
  0x7a PF: > { %s302_s21 = sand.u32 1, %s618_s9   ;;  %p900_p10 = scmp.ne.s32.totalorder %s892_s24, 0 }
  0x7b   : > { %p901_p12 = scmp.ge.s32.totalorder %s638_s14, 2  ;;  %s303_s20 = scalar_lea.sflag [#allocation4], %s302_s21 }
  0x7d   : > { %p433_p1 = pnand %p901_p12, %p900_p10 }
  0x7f   : > { %613 = dma.done.wait (!%p433_p1), %s303_s20, 512  }
  0x80   : > { %615 = vsyncadd (!%p433_p1), %s303_s20, 4294966784  ;;  %s21_s14 = sadd.s32 1, %s638_s14   ;;  %s902_s9 = smov %s622_s10 }
  0x81   : > { %p18_p2 = scmp.ge.s32.totalorder %s21_s14, 4   ;;  %s903_s10 = smov %s626_s11 }
  0x82   : > { %s904_s11 = smov %s717_s23  ;;  %s905_s12 = smov %s634_s13 }
  0x83   : > { %s906_s13 = smov %s908_s17  ;;  %20 = sbr.rel (!%p18_p2) target bundleno = 8 (0x8), region = 90 }
  0x8a   :  { %308 = vsyncpa [#allocation3], 1 }
  0x8b   :  { %310 = vsyncpa [#allocation3 + $0x1], 1 }
  0x8c   :  { %311 = vsyncpa [#allocation6], 1 }
  0x8d   :  { %313 = vsyncpa [#allocation6 + $0x1], 1 }
  0x8e   :  { %314 = vsyncpa [#allocation4], 1 }
  0x8f   :  { %316 = vsyncpa [#allocation4 + $0x1], 1 }

</bundles_post_ra>
